<compile_context>
chip_gen: v7x
topology: tpu7x:2x2x1
jax: 0.10.0
libtpu: 0.0.40
codegen_flags: <defaults>
</compile_context>

<pallas_src>
import jax
import jax.numpy as jnp
from jax import lax
from jax.experimental import pallas as pl
from jax.experimental.pallas import tpu as pltpu


def channel_attention_kernel(x_ref, w1_ref, w2_ref, o_ref):
    """x_ref: (L, C, TB)   w1_ref: (Cr, C)   w2_ref: (C, Cr)   o_ref: (C, TB)."""
    L = x_ref.shape[0]
    C, TB = o_ref.shape
    Cr = w1_ref.shape[0]

    # Tiny resident weights, loaded once per grid step.  All math stays in f32
    # (v5e has no bf16 VPU/EUP; MXU accumulates in f32 anyway).
    w1 = w1_ref[...].astype(jnp.float32)              # (Cr, C)
    w2 = w2_ref[...].astype(jnp.float32)              # (C, Cr)

    def step(l, run_h, run_mx):
        x_l = x_ref[l].astype(jnp.float32)             # (C, TB) lane-dense slab
        # 1x1 convs == channel contractions: plain 2-D MXU matmuls.
        h_l = jnp.maximum(
            jnp.dot(w1, x_l, preferred_element_type=jnp.float32), 0.0)   # (Cr, TB)
        y_l = jnp.dot(w2, h_l, preferred_element_type=jnp.float32)       # (C, TB)
        return run_h + h_l, jnp.maximum(run_mx, y_l)

    run_h = jnp.zeros((Cr, TB), jnp.float32)
    run_mx = jnp.full((C, TB), -jnp.inf, jnp.float32)
    if L <= 64:
        # Static unroll for small L: full visibility for the LLO scheduler.
        for l in range(L):
            run_h, run_mx = step(l, run_h, run_mx)
    else:
        run_h, run_mx = lax.fori_loop(
            0, L, lambda l, c: step(l, *c), (run_h, run_mx))

    # mean over L commutes with the (linear) second conv: pool the small hidden
    # and apply w2 once instead of re-reducing the full y.
    avg = jnp.dot(w2, run_h * (1.0 / L),
                  preferred_element_type=jnp.float32)                    # (C, TB)
    o_ref[...] = jax.nn.sigmoid(avg + run_mx).astype(o_ref.dtype)


def _pick_batch_block(B, C, L, Cr, x_itemsize, out_itemsize,
                      vmem_budget_bytes, multi_tc):
    """Largest batch (= lane) block that fits the VMEM budget."""
    per_b = (2 * L * C * x_itemsize        # x block, double buffered
             + 2 * C * out_itemsize        # output slab, double buffered
             + (3 * C + 2 * Cr) * 4)       # f32 intermediates (x_l, y_l, run_mx, h)
    tb_cap = max(1, vmem_budget_bytes // per_b)

    if multi_tc and B >= 256 and tb_cap >= 128:
        # v7x: split the batch across the two TensorCores.  Lane-axis blocks
        # that don't cover the full array must be multiples of 128.
        tb = min(tb_cap, (B + 1) // 2)
        tb = max(128, (tb // 128) * 128)
    elif B <= tb_cap:
        tb = B                             # single largest block (v5e / v6e)
    else:
        tb = max(128, (min(tb_cap, B) // 128) * 128)
    return min(tb, B)


def channel_attention(x, w1, w2, *, block_b=None,
                      vmem_budget_bytes=16 * 1024 * 1024):
    """x: (B, C, L); w1: (C//r, C); w2: (C, C//r).  Returns sigmoid gate (B, C, 1)."""
    B, C, L = x.shape
    Cr = w1.shape[0]
    assert w1.shape == (Cr, C) and w2.shape == (C, Cr)

    try:
        multi_tc = "7" in jax.devices()[0].device_kind   # v7x: 2 TensorCores/chip
    except Exception:  # pragma: no cover
        multi_tc = False

    out_dtype = x.dtype
    if block_b is None:
        tb = _pick_batch_block(B, C, L, Cr, x.dtype.itemsize,
                               jnp.dtype(out_dtype).itemsize,
                               vmem_budget_bytes, multi_tc)
    else:
        tb = int(block_b)
        if tb < B:                 # lane-axis blocks must be multiples of 128
            tb = max(128, (tb // 128) * 128)
        tb = min(tb, B)

    n_blocks = pl.cdiv(B, tb)
    Bp = n_blocks * tb

    # Layout plumbing (done once, wrapper side): batch on the minor axis gives
    # contiguous DMAs and unmasked full-width vector loads/stores.
    xt = jnp.transpose(x, (2, 1, 0))                        # (L, C, B)
    if Bp != B:
        xt = jnp.pad(xt, ((0, 0), (0, 0), (0, Bp - B)))     # pad lanes, sliced off below

    vmem_limit = int(min(64 * 1024 * 1024,
                         max(32 * 1024 * 1024, 2 * vmem_budget_bytes)))

    out = pl.pallas_call(
        channel_attention_kernel,
        out_shape=jax.ShapeDtypeStruct((C, Bp), out_dtype),
        grid_spec=pltpu.PrefetchScalarGridSpec(
            num_scalar_prefetch=0,
            grid=(n_blocks,),
            in_specs=[
                pl.BlockSpec((L, C, tb), lambda i: (0, 0, i)),
                pl.BlockSpec((Cr, C), lambda i: (0, 0)),      # resident weight
                pl.BlockSpec((C, Cr), lambda i: (0, 0)),      # resident weight
            ],
            out_specs=pl.BlockSpec((C, tb), lambda i: (0, i)),
        ),
        compiler_params=pltpu.CompilerParams(
            dimension_semantics=("parallel",),
            vmem_limit_bytes=vmem_limit),
    )(xt, w1, w2)

    return jnp.transpose(out[:, :B]).reshape(B, C, 1)


def reference(x, w1, w2):
    # pure-JAX reference of the PyTorch forward
    h = jnp.maximum(jnp.einsum("oc,bcl->bol", w1, x), 0.0)
    y = jnp.einsum("co,bol->bcl", w2, h)
    avg = jnp.mean(y, axis=-1, keepdims=True)
    mx = jnp.max(y, axis=-1, keepdims=True)
    return jax.nn.sigmoid(avg + mx)


if __name__ == "__main__":
    B, C, L, ratio = 2, 32, 16, 8      # planes=32, rotio=8 -> hidden Cr=4
    Cr = C // ratio

    key = jax.random.PRNGKey(0)
    kx, k1, k2, k3 = jax.random.split(key, 4)

    x = jax.random.normal(kx, (B, C, L), dtype=jnp.float32)
    # deterministic synthetic Conv1d kernel-size-1 weights (no bias)
    w1 = jax.random.normal(k1, (Cr, C), dtype=jnp.float32) * 0.1
    w2 = jax.random.normal(k2, (C, Cr), dtype=jnp.float32) * 0.1

    out = jax.block_until_ready(channel_attention(x, w1, w2))
    ref = reference(x, w1, w2)
    assert out.shape == (B, C, 1)
    assert jnp.allclose(out, ref, atol=1e-5, rtol=1e-5), \
        float(jnp.max(jnp.abs(out - ref)))

    # Exercise the multi-block + padded-batch path (tb=128, grid=3, Bp=384).
    B2 = 300
    x2 = jax.random.normal(k3, (B2, C, L), dtype=jnp.float32)
    out2 = jax.block_until_ready(channel_attention(x2, w1, w2, block_b=128))
    ref2 = reference(x2, w1, w2)
    assert out2.shape == (B2, C, 1)
    assert jnp.allclose(out2, ref2, atol=1e-5, rtol=1e-5), \
        float(jnp.max(jnp.abs(out2 - ref2)))

    print("KERNEL_OK")
</pallas_src>

<mosaic_0001>
module attributes {stable_mosaic.version = 11 : i64} {
  func.func @channel_attention_kernel(%arg0: i32, %arg1: memref<16x32x2xf32, #tpu.memory_space<vmem>>, %arg2: memref<4x32xf32, #tpu.memory_space<vmem>>, %arg3: memref<32x4xf32, #tpu.memory_space<vmem>>, %arg4: memref<32x2xf32, #tpu.memory_space<vmem>>) attributes {dimension_semantics = [#tpu.dimension_semantics<parallel>], iteration_bounds = array<i64: 1>, scalar_prefetch = 0 : i64, scratch_operands = 0 : i64, tpu.core_type = #tpu.core_type<tc>, window_params = [{transform_indices = @transform_0, window_bounds = array<i64: 16, 32, 2>}, {pipeline_mode = #tpu.pipeline_mode<synchronous>, transform_indices = @transform_1, window_bounds = array<i64: 4, 32>}, {pipeline_mode = #tpu.pipeline_mode<synchronous>, transform_indices = @transform_2, window_bounds = array<i64: 32, 4>}, {transform_indices = @transform_3, window_bounds = array<i64: 32, 2>}]} {
    %c0 = arith.constant 0 : index
    %c0_0 = arith.constant 0 : index
    %0 = vector.load %arg2[%c0, %c0_0] : memref<4x32xf32, #tpu.memory_space<vmem>>, vector<4x32xf32>
    %c0_1 = arith.constant 0 : index
    %c0_2 = arith.constant 0 : index
    %1 = vector.load %arg3[%c0_1, %c0_2] : memref<32x4xf32, #tpu.memory_space<vmem>>, vector<32x4xf32>
    %cst = arith.constant 0.000000e+00 : f32
    %2 = vector.broadcast %cst : f32 to vector<4x2xf32>
    %cst_3 = arith.constant 0xFF800000 : f32
    %3 = vector.broadcast %cst_3 : f32 to vector<32x2xf32>
    %c0_4 = arith.constant 0 : index
    %c0_5 = arith.constant 0 : index
    %c0_6 = arith.constant 0 : index
    %4 = vector.load %arg1[%c0_4, %c0_5, %c0_6] : memref<16x32x2xf32, #tpu.memory_space<vmem>>, vector<1x32x2xf32>
    %5 = vector.shape_cast %4 : vector<1x32x2xf32> to vector<32x2xf32>
    %cst_7 = arith.constant dense<0.000000e+00> : vector<4x2xf32>
    %6 = tpu.matmul %0, %5, %cst_7 {dimension_numbers = #tpu.dot_dimension_numbers<[1], [0], [0], [1], [0, 0, 1, 1], [], []>} : vector<4x32xf32>, vector<32x2xf32>, vector<4x2xf32> -> vector<4x2xf32>
    %cst_8 = arith.constant 0.000000e+00 : f32
    %7 = vector.broadcast %cst_8 : f32 to vector<4x2xf32>
    %8 = arith.maximumf %6, %7 : vector<4x2xf32>
    %cst_9 = arith.constant dense<0.000000e+00> : vector<32x2xf32>
    %9 = tpu.matmul %1, %8, %cst_9 {dimension_numbers = #tpu.dot_dimension_numbers<[1], [0], [0], [1], [0, 0, 1, 1], [], []>} : vector<32x4xf32>, vector<4x2xf32>, vector<32x2xf32> -> vector<32x2xf32>
    %10 = arith.addf %2, %8 : vector<4x2xf32>
    %11 = arith.maximumf %3, %9 : vector<32x2xf32>
    %c1 = arith.constant 1 : index
    %c0_10 = arith.constant 0 : index
    %c0_11 = arith.constant 0 : index
    %12 = vector.load %arg1[%c1, %c0_10, %c0_11] : memref<16x32x2xf32, #tpu.memory_space<vmem>>, vector<1x32x2xf32>
    %13 = vector.shape_cast %12 : vector<1x32x2xf32> to vector<32x2xf32>
    %cst_12 = arith.constant dense<0.000000e+00> : vector<4x2xf32>
    %14 = tpu.matmul %0, %13, %cst_12 {dimension_numbers = #tpu.dot_dimension_numbers<[1], [0], [0], [1], [0, 0, 1, 1], [], []>} : vector<4x32xf32>, vector<32x2xf32>, vector<4x2xf32> -> vector<4x2xf32>
    %cst_13 = arith.constant 0.000000e+00 : f32
    %15 = vector.broadcast %cst_13 : f32 to vector<4x2xf32>
    %16 = arith.maximumf %14, %15 : vector<4x2xf32>
    %cst_14 = arith.constant dense<0.000000e+00> : vector<32x2xf32>
    %17 = tpu.matmul %1, %16, %cst_14 {dimension_numbers = #tpu.dot_dimension_numbers<[1], [0], [0], [1], [0, 0, 1, 1], [], []>} : vector<32x4xf32>, vector<4x2xf32>, vector<32x2xf32> -> vector<32x2xf32>
    %18 = arith.addf %10, %16 : vector<4x2xf32>
    %19 = arith.maximumf %11, %17 : vector<32x2xf32>
    %c2 = arith.constant 2 : index
    %c0_15 = arith.constant 0 : index
    %c0_16 = arith.constant 0 : index
    %20 = vector.load %arg1[%c2, %c0_15, %c0_16] : memref<16x32x2xf32, #tpu.memory_space<vmem>>, vector<1x32x2xf32>
    %21 = vector.shape_cast %20 : vector<1x32x2xf32> to vector<32x2xf32>
    %cst_17 = arith.constant dense<0.000000e+00> : vector<4x2xf32>
    %22 = tpu.matmul %0, %21, %cst_17 {dimension_numbers = #tpu.dot_dimension_numbers<[1], [0], [0], [1], [0, 0, 1, 1], [], []>} : vector<4x32xf32>, vector<32x2xf32>, vector<4x2xf32> -> vector<4x2xf32>
    %cst_18 = arith.constant 0.000000e+00 : f32
    %23 = vector.broadcast %cst_18 : f32 to vector<4x2xf32>
    %24 = arith.maximumf %22, %23 : vector<4x2xf32>
    %cst_19 = arith.constant dense<0.000000e+00> : vector<32x2xf32>
    %25 = tpu.matmul %1, %24, %cst_19 {dimension_numbers = #tpu.dot_dimension_numbers<[1], [0], [0], [1], [0, 0, 1, 1], [], []>} : vector<32x4xf32>, vector<4x2xf32>, vector<32x2xf32> -> vector<32x2xf32>
    %26 = arith.addf %18, %24 : vector<4x2xf32>
    %27 = arith.maximumf %19, %25 : vector<32x2xf32>
    %c3 = arith.constant 3 : index
    %c0_20 = arith.constant 0 : index
    %c0_21 = arith.constant 0 : index
    %28 = vector.load %arg1[%c3, %c0_20, %c0_21] : memref<16x32x2xf32, #tpu.memory_space<vmem>>, vector<1x32x2xf32>
    %29 = vector.shape_cast %28 : vector<1x32x2xf32> to vector<32x2xf32>
    %cst_22 = arith.constant dense<0.000000e+00> : vector<4x2xf32>
    %30 = tpu.matmul %0, %29, %cst_22 {dimension_numbers = #tpu.dot_dimension_numbers<[1], [0], [0], [1], [0, 0, 1, 1], [], []>} : vector<4x32xf32>, vector<32x2xf32>, vector<4x2xf32> -> vector<4x2xf32>
    %cst_23 = arith.constant 0.000000e+00 : f32
    %31 = vector.broadcast %cst_23 : f32 to vector<4x2xf32>
    %32 = arith.maximumf %30, %31 : vector<4x2xf32>
    %cst_24 = arith.constant dense<0.000000e+00> : vector<32x2xf32>
    %33 = tpu.matmul %1, %32, %cst_24 {dimension_numbers = #tpu.dot_dimension_numbers<[1], [0], [0], [1], [0, 0, 1, 1], [], []>} : vector<32x4xf32>, vector<4x2xf32>, vector<32x2xf32> -> vector<32x2xf32>
    %34 = arith.addf %26, %32 : vector<4x2xf32>
    %35 = arith.maximumf %27, %33 : vector<32x2xf32>
    %c4 = arith.constant 4 : index
    %c0_25 = arith.constant 0 : index
    %c0_26 = arith.constant 0 : index
    %36 = vector.load %arg1[%c4, %c0_25, %c0_26] : memref<16x32x2xf32, #tpu.memory_space<vmem>>, vector<1x32x2xf32>
    %37 = vector.shape_cast %36 : vector<1x32x2xf32> to vector<32x2xf32>
    %cst_27 = arith.constant dense<0.000000e+00> : vector<4x2xf32>
    %38 = tpu.matmul %0, %37, %cst_27 {dimension_numbers = #tpu.dot_dimension_numbers<[1], [0], [0], [1], [0, 0, 1, 1], [], []>} : vector<4x32xf32>, vector<32x2xf32>, vector<4x2xf32> -> vector<4x2xf32>
    %cst_28 = arith.constant 0.000000e+00 : f32
    %39 = vector.broadcast %cst_28 : f32 to vector<4x2xf32>
    %40 = arith.maximumf %38, %39 : vector<4x2xf32>
    %cst_29 = arith.constant dense<0.000000e+00> : vector<32x2xf32>
    %41 = tpu.matmul %1, %40, %cst_29 {dimension_numbers = #tpu.dot_dimension_numbers<[1], [0], [0], [1], [0, 0, 1, 1], [], []>} : vector<32x4xf32>, vector<4x2xf32>, vector<32x2xf32> -> vector<32x2xf32>
    %42 = arith.addf %34, %40 : vector<4x2xf32>
    %43 = arith.maximumf %35, %41 : vector<32x2xf32>
    %c5 = arith.constant 5 : index
    %c0_30 = arith.constant 0 : index
    %c0_31 = arith.constant 0 : index
    %44 = vector.load %arg1[%c5, %c0_30, %c0_31] : memref<16x32x2xf32, #tpu.memory_space<vmem>>, vector<1x32x2xf32>
    %45 = vector.shape_cast %44 : vector<1x32x2xf32> to vector<32x2xf32>
    %cst_32 = arith.constant dense<0.000000e+00> : vector<4x2xf32>
    %46 = tpu.matmul %0, %45, %cst_32 {dimension_numbers = #tpu.dot_dimension_numbers<[1], [0], [0], [1], [0, 0, 1, 1], [], []>} : vector<4x32xf32>, vector<32x2xf32>, vector<4x2xf32> -> vector<4x2xf32>
    %cst_33 = arith.constant 0.000000e+00 : f32
    %47 = vector.broadcast %cst_33 : f32 to vector<4x2xf32>
    %48 = arith.maximumf %46, %47 : vector<4x2xf32>
    %cst_34 = arith.constant dense<0.000000e+00> : vector<32x2xf32>
    %49 = tpu.matmul %1, %48, %cst_34 {dimension_numbers = #tpu.dot_dimension_numbers<[1], [0], [0], [1], [0, 0, 1, 1], [], []>} : vector<32x4xf32>, vector<4x2xf32>, vector<32x2xf32> -> vector<32x2xf32>
    %50 = arith.addf %42, %48 : vector<4x2xf32>
    %51 = arith.maximumf %43, %49 : vector<32x2xf32>
    %c6 = arith.constant 6 : index
    %c0_35 = arith.constant 0 : index
    %c0_36 = arith.constant 0 : index
    %52 = vector.load %arg1[%c6, %c0_35, %c0_36] : memref<16x32x2xf32, #tpu.memory_space<vmem>>, vector<1x32x2xf32>
    %53 = vector.shape_cast %52 : vector<1x32x2xf32> to vector<32x2xf32>
    %cst_37 = arith.constant dense<0.000000e+00> : vector<4x2xf32>
    %54 = tpu.matmul %0, %53, %cst_37 {dimension_numbers = #tpu.dot_dimension_numbers<[1], [0], [0], [1], [0, 0, 1, 1], [], []>} : vector<4x32xf32>, vector<32x2xf32>, vector<4x2xf32> -> vector<4x2xf32>
    %cst_38 = arith.constant 0.000000e+00 : f32
    %55 = vector.broadcast %cst_38 : f32 to vector<4x2xf32>
    %56 = arith.maximumf %54, %55 : vector<4x2xf32>
    %cst_39 = arith.constant dense<0.000000e+00> : vector<32x2xf32>
    %57 = tpu.matmul %1, %56, %cst_39 {dimension_numbers = #tpu.dot_dimension_numbers<[1], [0], [0], [1], [0, 0, 1, 1], [], []>} : vector<32x4xf32>, vector<4x2xf32>, vector<32x2xf32> -> vector<32x2xf32>
    %58 = arith.addf %50, %56 : vector<4x2xf32>
    %59 = arith.maximumf %51, %57 : vector<32x2xf32>
    %c7 = arith.constant 7 : index
    %c0_40 = arith.constant 0 : index
    %c0_41 = arith.constant 0 : index
    %60 = vector.load %arg1[%c7, %c0_40, %c0_41] : memref<16x32x2xf32, #tpu.memory_space<vmem>>, vector<1x32x2xf32>
    %61 = vector.shape_cast %60 : vector<1x32x2xf32> to vector<32x2xf32>
    %cst_42 = arith.constant dense<0.000000e+00> : vector<4x2xf32>
    %62 = tpu.matmul %0, %61, %cst_42 {dimension_numbers = #tpu.dot_dimension_numbers<[1], [0], [0], [1], [0, 0, 1, 1], [], []>} : vector<4x32xf32>, vector<32x2xf32>, vector<4x2xf32> -> vector<4x2xf32>
    %cst_43 = arith.constant 0.000000e+00 : f32
    %63 = vector.broadcast %cst_43 : f32 to vector<4x2xf32>
    %64 = arith.maximumf %62, %63 : vector<4x2xf32>
    %cst_44 = arith.constant dense<0.000000e+00> : vector<32x2xf32>
    %65 = tpu.matmul %1, %64, %cst_44 {dimension_numbers = #tpu.dot_dimension_numbers<[1], [0], [0], [1], [0, 0, 1, 1], [], []>} : vector<32x4xf32>, vector<4x2xf32>, vector<32x2xf32> -> vector<32x2xf32>
    %66 = arith.addf %58, %64 : vector<4x2xf32>
    %67 = arith.maximumf %59, %65 : vector<32x2xf32>
    %c8 = arith.constant 8 : index
    %c0_45 = arith.constant 0 : index
    %c0_46 = arith.constant 0 : index
    %68 = vector.load %arg1[%c8, %c0_45, %c0_46] : memref<16x32x2xf32, #tpu.memory_space<vmem>>, vector<1x32x2xf32>
    %69 = vector.shape_cast %68 : vector<1x32x2xf32> to vector<32x2xf32>
    %cst_47 = arith.constant dense<0.000000e+00> : vector<4x2xf32>
    %70 = tpu.matmul %0, %69, %cst_47 {dimension_numbers = #tpu.dot_dimension_numbers<[1], [0], [0], [1], [0, 0, 1, 1], [], []>} : vector<4x32xf32>, vector<32x2xf32>, vector<4x2xf32> -> vector<4x2xf32>
    %cst_48 = arith.constant 0.000000e+00 : f32
    %71 = vector.broadcast %cst_48 : f32 to vector<4x2xf32>
    %72 = arith.maximumf %70, %71 : vector<4x2xf32>
    %cst_49 = arith.constant dense<0.000000e+00> : vector<32x2xf32>
    %73 = tpu.matmul %1, %72, %cst_49 {dimension_numbers = #tpu.dot_dimension_numbers<[1], [0], [0], [1], [0, 0, 1, 1], [], []>} : vector<32x4xf32>, vector<4x2xf32>, vector<32x2xf32> -> vector<32x2xf32>
    %74 = arith.addf %66, %72 : vector<4x2xf32>
    %75 = arith.maximumf %67, %73 : vector<32x2xf32>
    %c9 = arith.constant 9 : index
    %c0_50 = arith.constant 0 : index
    %c0_51 = arith.constant 0 : index
    %76 = vector.load %arg1[%c9, %c0_50, %c0_51] : memref<16x32x2xf32, #tpu.memory_space<vmem>>, vector<1x32x2xf32>
    %77 = vector.shape_cast %76 : vector<1x32x2xf32> to vector<32x2xf32>
    %cst_52 = arith.constant dense<0.000000e+00> : vector<4x2xf32>
    %78 = tpu.matmul %0, %77, %cst_52 {dimension_numbers = #tpu.dot_dimension_numbers<[1], [0], [0], [1], [0, 0, 1, 1], [], []>} : vector<4x32xf32>, vector<32x2xf32>, vector<4x2xf32> -> vector<4x2xf32>
    %cst_53 = arith.constant 0.000000e+00 : f32
    %79 = vector.broadcast %cst_53 : f32 to vector<4x2xf32>
    %80 = arith.maximumf %78, %79 : vector<4x2xf32>
    %cst_54 = arith.constant dense<0.000000e+00> : vector<32x2xf32>
    %81 = tpu.matmul %1, %80, %cst_54 {dimension_numbers = #tpu.dot_dimension_numbers<[1], [0], [0], [1], [0, 0, 1, 1], [], []>} : vector<32x4xf32>, vector<4x2xf32>, vector<32x2xf32> -> vector<32x2xf32>
    %82 = arith.addf %74, %80 : vector<4x2xf32>
    %83 = arith.maximumf %75, %81 : vector<32x2xf32>
    %c10 = arith.constant 10 : index
    %c0_55 = arith.constant 0 : index
    %c0_56 = arith.constant 0 : index
    %84 = vector.load %arg1[%c10, %c0_55, %c0_56] : memref<16x32x2xf32, #tpu.memory_space<vmem>>, vector<1x32x2xf32>
    %85 = vector.shape_cast %84 : vector<1x32x2xf32> to vector<32x2xf32>
    %cst_57 = arith.constant dense<0.000000e+00> : vector<4x2xf32>
    %86 = tpu.matmul %0, %85, %cst_57 {dimension_numbers = #tpu.dot_dimension_numbers<[1], [0], [0], [1], [0, 0, 1, 1], [], []>} : vector<4x32xf32>, vector<32x2xf32>, vector<4x2xf32> -> vector<4x2xf32>
    %cst_58 = arith.constant 0.000000e+00 : f32
    %87 = vector.broadcast %cst_58 : f32 to vector<4x2xf32>
    %88 = arith.maximumf %86, %87 : vector<4x2xf32>
    %cst_59 = arith.constant dense<0.000000e+00> : vector<32x2xf32>
    %89 = tpu.matmul %1, %88, %cst_59 {dimension_numbers = #tpu.dot_dimension_numbers<[1], [0], [0], [1], [0, 0, 1, 1], [], []>} : vector<32x4xf32>, vector<4x2xf32>, vector<32x2xf32> -> vector<32x2xf32>
    %90 = arith.addf %82, %88 : vector<4x2xf32>
    %91 = arith.maximumf %83, %89 : vector<32x2xf32>
    %c11 = arith.constant 11 : index
    %c0_60 = arith.constant 0 : index
    %c0_61 = arith.constant 0 : index
    %92 = vector.load %arg1[%c11, %c0_60, %c0_61] : memref<16x32x2xf32, #tpu.memory_space<vmem>>, vector<1x32x2xf32>
    %93 = vector.shape_cast %92 : vector<1x32x2xf32> to vector<32x2xf32>
    %cst_62 = arith.constant dense<0.000000e+00> : vector<4x2xf32>
    %94 = tpu.matmul %0, %93, %cst_62 {dimension_numbers = #tpu.dot_dimension_numbers<[1], [0], [0], [1], [0, 0, 1, 1], [], []>} : vector<4x32xf32>, vector<32x2xf32>, vector<4x2xf32> -> vector<4x2xf32>
    %cst_63 = arith.constant 0.000000e+00 : f32
    %95 = vector.broadcast %cst_63 : f32 to vector<4x2xf32>
    %96 = arith.maximumf %94, %95 : vector<4x2xf32>
    %cst_64 = arith.constant dense<0.000000e+00> : vector<32x2xf32>
    %97 = tpu.matmul %1, %96, %cst_64 {dimension_numbers = #tpu.dot_dimension_numbers<[1], [0], [0], [1], [0, 0, 1, 1], [], []>} : vector<32x4xf32>, vector<4x2xf32>, vector<32x2xf32> -> vector<32x2xf32>
    %98 = arith.addf %90, %96 : vector<4x2xf32>
    %99 = arith.maximumf %91, %97 : vector<32x2xf32>
    %c12 = arith.constant 12 : index
    %c0_65 = arith.constant 0 : index
    %c0_66 = arith.constant 0 : index
    %100 = vector.load %arg1[%c12, %c0_65, %c0_66] : memref<16x32x2xf32, #tpu.memory_space<vmem>>, vector<1x32x2xf32>
    %101 = vector.shape_cast %100 : vector<1x32x2xf32> to vector<32x2xf32>
    %cst_67 = arith.constant dense<0.000000e+00> : vector<4x2xf32>
    %102 = tpu.matmul %0, %101, %cst_67 {dimension_numbers = #tpu.dot_dimension_numbers<[1], [0], [0], [1], [0, 0, 1, 1], [], []>} : vector<4x32xf32>, vector<32x2xf32>, vector<4x2xf32> -> vector<4x2xf32>
    %cst_68 = arith.constant 0.000000e+00 : f32
    %103 = vector.broadcast %cst_68 : f32 to vector<4x2xf32>
    %104 = arith.maximumf %102, %103 : vector<4x2xf32>
    %cst_69 = arith.constant dense<0.000000e+00> : vector<32x2xf32>
    %105 = tpu.matmul %1, %104, %cst_69 {dimension_numbers = #tpu.dot_dimension_numbers<[1], [0], [0], [1], [0, 0, 1, 1], [], []>} : vector<32x4xf32>, vector<4x2xf32>, vector<32x2xf32> -> vector<32x2xf32>
    %106 = arith.addf %98, %104 : vector<4x2xf32>
    %107 = arith.maximumf %99, %105 : vector<32x2xf32>
    %c13 = arith.constant 13 : index
    %c0_70 = arith.constant 0 : index
    %c0_71 = arith.constant 0 : index
    %108 = vector.load %arg1[%c13, %c0_70, %c0_71] : memref<16x32x2xf32, #tpu.memory_space<vmem>>, vector<1x32x2xf32>
    %109 = vector.shape_cast %108 : vector<1x32x2xf32> to vector<32x2xf32>
    %cst_72 = arith.constant dense<0.000000e+00> : vector<4x2xf32>
    %110 = tpu.matmul %0, %109, %cst_72 {dimension_numbers = #tpu.dot_dimension_numbers<[1], [0], [0], [1], [0, 0, 1, 1], [], []>} : vector<4x32xf32>, vector<32x2xf32>, vector<4x2xf32> -> vector<4x2xf32>
    %cst_73 = arith.constant 0.000000e+00 : f32
    %111 = vector.broadcast %cst_73 : f32 to vector<4x2xf32>
    %112 = arith.maximumf %110, %111 : vector<4x2xf32>
    %cst_74 = arith.constant dense<0.000000e+00> : vector<32x2xf32>
    %113 = tpu.matmul %1, %112, %cst_74 {dimension_numbers = #tpu.dot_dimension_numbers<[1], [0], [0], [1], [0, 0, 1, 1], [], []>} : vector<32x4xf32>, vector<4x2xf32>, vector<32x2xf32> -> vector<32x2xf32>
    %114 = arith.addf %106, %112 : vector<4x2xf32>
    %115 = arith.maximumf %107, %113 : vector<32x2xf32>
    %c14 = arith.constant 14 : index
    %c0_75 = arith.constant 0 : index
    %c0_76 = arith.constant 0 : index
    %116 = vector.load %arg1[%c14, %c0_75, %c0_76] : memref<16x32x2xf32, #tpu.memory_space<vmem>>, vector<1x32x2xf32>
    %117 = vector.shape_cast %116 : vector<1x32x2xf32> to vector<32x2xf32>
    %cst_77 = arith.constant dense<0.000000e+00> : vector<4x2xf32>
    %118 = tpu.matmul %0, %117, %cst_77 {dimension_numbers = #tpu.dot_dimension_numbers<[1], [0], [0], [1], [0, 0, 1, 1], [], []>} : vector<4x32xf32>, vector<32x2xf32>, vector<4x2xf32> -> vector<4x2xf32>
    %cst_78 = arith.constant 0.000000e+00 : f32
    %119 = vector.broadcast %cst_78 : f32 to vector<4x2xf32>
    %120 = arith.maximumf %118, %119 : vector<4x2xf32>
    %cst_79 = arith.constant dense<0.000000e+00> : vector<32x2xf32>
    %121 = tpu.matmul %1, %120, %cst_79 {dimension_numbers = #tpu.dot_dimension_numbers<[1], [0], [0], [1], [0, 0, 1, 1], [], []>} : vector<32x4xf32>, vector<4x2xf32>, vector<32x2xf32> -> vector<32x2xf32>
    %122 = arith.addf %114, %120 : vector<4x2xf32>
    %123 = arith.maximumf %115, %121 : vector<32x2xf32>
    %c15 = arith.constant 15 : index
    %c0_80 = arith.constant 0 : index
    %c0_81 = arith.constant 0 : index
    %124 = vector.load %arg1[%c15, %c0_80, %c0_81] : memref<16x32x2xf32, #tpu.memory_space<vmem>>, vector<1x32x2xf32>
    %125 = vector.shape_cast %124 : vector<1x32x2xf32> to vector<32x2xf32>
    %cst_82 = arith.constant dense<0.000000e+00> : vector<4x2xf32>
    %126 = tpu.matmul %0, %125, %cst_82 {dimension_numbers = #tpu.dot_dimension_numbers<[1], [0], [0], [1], [0, 0, 1, 1], [], []>} : vector<4x32xf32>, vector<32x2xf32>, vector<4x2xf32> -> vector<4x2xf32>
    %cst_83 = arith.constant 0.000000e+00 : f32
    %127 = vector.broadcast %cst_83 : f32 to vector<4x2xf32>
    %128 = arith.maximumf %126, %127 : vector<4x2xf32>
    %cst_84 = arith.constant dense<0.000000e+00> : vector<32x2xf32>
    %129 = tpu.matmul %1, %128, %cst_84 {dimension_numbers = #tpu.dot_dimension_numbers<[1], [0], [0], [1], [0, 0, 1, 1], [], []>} : vector<32x4xf32>, vector<4x2xf32>, vector<32x2xf32> -> vector<32x2xf32>
    %130 = arith.addf %122, %128 : vector<4x2xf32>
    %131 = arith.maximumf %123, %129 : vector<32x2xf32>
    %cst_85 = arith.constant 6.250000e-02 : f32
    %132 = vector.broadcast %cst_85 : f32 to vector<4x2xf32>
    %133 = arith.mulf %130, %132 : vector<4x2xf32>
    %cst_86 = arith.constant dense<0.000000e+00> : vector<32x2xf32>
    %134 = tpu.matmul %1, %133, %cst_86 {dimension_numbers = #tpu.dot_dimension_numbers<[1], [0], [0], [1], [0, 0, 1, 1], [], []>} : vector<32x4xf32>, vector<4x2xf32>, vector<32x2xf32> -> vector<32x2xf32>
    %135 = arith.addf %134, %131 : vector<32x2xf32>
    %136 = arith.negf %135 : vector<32x2xf32>
    %137 = math.exp %136 : vector<32x2xf32>
    %cst_87 = arith.constant 1.000000e+00 : f32
    %138 = vector.broadcast %cst_87 : f32 to vector<32x2xf32>
    %139 = arith.addf %138, %137 : vector<32x2xf32>
    %140 = arith.divf %138, %139 : vector<32x2xf32>
    %c0_88 = arith.constant 0 : index
    %c0_89 = arith.constant 0 : index
    %141 = vector.load %arg4[%c0_88, %c0_89] : memref<32x2xf32, #tpu.memory_space<vmem>>, vector<32x2xf32>
    tpu.vector_store %arg4[%c0_88, %c0_89], %140 {strides = array<i32>} : memref<32x2xf32, #tpu.memory_space<vmem>>, vector<32x2xf32>,
    return
  }
  func.func @transform_0(%arg0: i32) -> (i32, i32, i32) {
    %c0_i32 = arith.constant 0 : i32
    %c0_i32_0 = arith.constant 0 : i32
    %c0_i32_1 = arith.constant 0 : i32
    return %c0_i32, %c0_i32_0, %arg0 : i32, i32, i32
  }
  func.func @transform_1(%arg0: i32) -> (i32, i32) {
    %c0_i32 = arith.constant 0 : i32
    %c0_i32_0 = arith.constant 0 : i32
    %c0_i32_1 = arith.constant 0 : i32
    return %c0_i32, %c0_i32_0 : i32, i32
  }
  func.func @transform_2(%arg0: i32) -> (i32, i32) {
    %c0_i32 = arith.constant 0 : i32
    %c0_i32_0 = arith.constant 0 : i32
    %c0_i32_1 = arith.constant 0 : i32
    return %c0_i32, %c0_i32_0 : i32, i32
  }
  func.func @transform_3(%arg0: i32) -> (i32, i32) {
    %c0_i32 = arith.constant 0 : i32
    %c0_i32_0 = arith.constant 0 : i32
    return %c0_i32, %arg0 : i32, i32
  }
}

</mosaic_0001>

<bundles_post_ra>
// kernel: tpu_custom_call.1
= control target key start
LH: loop header
LB: loop body
LE: loop exit
PB: predicated region body
PF: predicated region fallthrough
CT: control target
= control target key end

     0   :  { %v3615_v0 = vmov 0.0|0.0   ;;  %vm3616_vm0 = vmmov 0   ;;  %v3617_v4 = vmov 0.0   ;;  %vm23_vm1 = vcmask 261120   ;;  %s4150_s0 = inlined_call_operand.vmem [shape: f32[16,32,2], index: 0, kind: input, shape index: {}]   ;;  %s4151_s1 = inlined_call_operand.vmem [shape: f32[4,32], index: 1, kind: input, shape index: {}]   ;;  %s4152_s2 = inlined_call_operand.vmem [shape: f32[32,4], index: 2, kind: input, shape index: {}]   ;;  %s4153_s3 = inlined_call_operand.vmem [shape: f32[32,2], index: 3, kind: output, shape index: {}]  }
   0x1   :  { %3500 = vmatprep.subr.bf16.mxu0 %v3615_v0  ;;  %v19_v1 = vld [vmem:[%s4150_s0] sm:$0xff]  ;;  %v20_v2 = vld [vmem:[%s4150_s0 + $0x8] sm:$0xff]  ;;  %v21_v3 = vld [vmem:[%s4150_s0 + $0x10] sm:$0xff]  ;;  %3196 = vmatprep.mubr.msk.f32.mxu0 %vm3616_vm0, %v3617_v4  ;;  %vm98_vm2 = vcmask 31744   ;;  %vm111_vm3 = vcmask 1043456   ;;  %vm2849_vm4 = vcmask 15360  }
   0x2   :  { %v3501_v5 = vpack.c.bf16 %v20_v2, %v19_v1  ;;  %v22_v6 = vld [vmem:[%s4150_s0 + $0x18] sm:$0xff]  ;;  %v3657_v8 = vld [vmem:[%s4151_s1] sm:$0xf]  ;;  %v2865_v11 = vld [vmem:[%s4150_s0 + $0x28] sm:$0xff] }
   0x3   :  { %v3504_v7 = vpack.c.bf16 %v22_v6, %v21_v3  ;;  %v3664_v9 = vld [vmem:[%s4152_s2] sm:$0xff]  ;;  %v3681_v15 = vld [vmem:[%s4152_s2 + $0x8] sm:$0xff]  ;;  %v3688_v17 = vld [vmem:[%s4152_s2 + $0x10] sm:$0xff] }
   0x4   :  { %3502 = vmatpush3.bf16.msra.mxu0 %v3501_v5  ;;  %3201 = vmatprep.mubr.msk.f32.mxu1 %vm98_vm2, %v3664_v9  ;;  %v2864_v10 = vld [vmem:[%s4150_s0 + $0x20] sm:$0xff]  ;;  %v2866_v18 = vld [vmem:[%s4150_s0 + $0x30] sm:$0xff]  ;;  %v2867_v19 = vld [vmem:[%s4150_s0 + $0x38] sm:$0xff] }
   0x5   :  { %3503 = vmatprep.subr.bf16.mxu0 %v3615_v0  ;;  %v3507_v16 = vpack.c.bf16 %v2865_v11, %v2864_v10  ;;  %v3706_v20 = vld [vmem:[%s4152_s2 + $0x18] sm:$0xff]  ;;  %v3510_v21 = vpack.c.bf16 %v2867_v19, %v2866_v18  ;;  %v2874_v22 = vld [vmem:[%s4150_s0 + $0x40] sm:$0xff]  ;;  %v2875_v23 = vld [vmem:[%s4150_s0 + $0x48] sm:$0xff] }
   0x6   :  { %v3513_v24 = vpack.c.bf16 %v2875_v23, %v2874_v22  ;;  %v2876_v25 = vld [vmem:[%s4150_s0 + $0x50] sm:$0xff]  ;;  %v2877_v26 = vld [vmem:[%s4150_s0 + $0x58] sm:$0xff]  ;;  %v2884_v28 = vld [vmem:[%s4150_s0 + $0x60] sm:$0xff] }
   0x7   :  { %v3516_v27 = vpack.c.bf16 %v2877_v26, %v2876_v25  ;;  %v2885_v29 = vld [vmem:[%s4150_s0 + $0x68] sm:$0xff]  ;;  %v2886_v31 = vld [vmem:[%s4150_s0 + $0x70] sm:$0xff]  ;;  %v2887_v32 = vld [vmem:[%s4150_s0 + $0x78] sm:$0xff] }
   0x8   :  { %3505 = vmatpush3.bf16.msra.mxu0 %v3504_v7  ;;  %v3519_v30 = vpack.c.bf16 %v2885_v29, %v2884_v28  ;;  %v3522_v33 = vpack.c.bf16 %v2887_v32, %v2886_v31  ;;  %v2894_v34 = vld [vmem:[%s4150_s0 + $0x80] sm:$0xff]  ;;  %v2895_v35 = vld [vmem:[%s4150_s0 + $0x88] sm:$0xff]  ;;  %v2896_v37 = vld [vmem:[%s4150_s0 + $0x90] sm:$0xff] }
   0x9   :  { %v3525_v36 = vpack.c.bf16 %v2895_v35, %v2894_v34  ;;  %v2897_v38 = vld [vmem:[%s4150_s0 + $0x98] sm:$0xff]  ;;  %v2904_v40 = vld [vmem:[%s4150_s0 + $0xa0] sm:$0xff]  ;;  %v2905_v41 = vld [vmem:[%s4150_s0 + $0xa8] sm:$0xff] }
   0xa   :  { %v3528_v39 = vpack.c.bf16 %v2897_v38, %v2896_v37  ;;  %v3531_v42 = vpack.c.bf16 %v2905_v41, %v2904_v40  ;;  %v2906_v43 = vld [vmem:[%s4150_s0 + $0xb0] sm:$0xff]  ;;  %v2907_v44 = vld [vmem:[%s4150_s0 + $0xb8] sm:$0xff]  ;;  %v2914_v46 = vld [vmem:[%s4150_s0 + $0xc0] sm:$0xff] }
   0xb   :  { %3197 = vmatmul.mubr.msk.f32.vlgmr.msra.gmra.mrb[0].mxu0 %vm23_vm1, %v3657_v8  ;;  %v3534_v45 = vpack.c.bf16 %v2907_v44, %v2906_v43  ;;  %v2915_v47 = vld [vmem:[%s4150_s0 + $0xc8] sm:$0xff]  ;;  %v2916_v49 = vld [vmem:[%s4150_s0 + $0xd0] sm:$0xff]  ;;  %v2917_v50 = vld [vmem:[%s4150_s0 + $0xd8] sm:$0xff] }
   0xc   :  { %3220 = vmatprep.mubr.msk.f32.mxu0 %vm98_vm2, %v3664_v9  ;;  %v3537_v48 = vpack.c.bf16 %v2915_v47, %v2914_v46  ;;  %v3540_v51 = vpack.c.bf16 %v2917_v50, %v2916_v49  ;;  %v2924_v52 = vld [vmem:[%s4150_s0 + $0xe0] sm:$0xff]  ;;  %v2925_v53 = vld [vmem:[%s4150_s0 + $0xe8] sm:$0xff]  ;;  %v2926_v55 = vld [vmem:[%s4150_s0 + $0xf0] sm:$0xff] }
   0xd   :  { %v3543_v54 = vpack.c.bf16 %v2925_v53, %v2924_v52  ;;  %v2927_v56 = vld [vmem:[%s4150_s0 + $0xf8] sm:$0xff]  ;;  %v2934_v58 = vld [vmem:[%s4150_s0 + $0x100] sm:$0xff]  ;;  %v2935_v59 = vld [vmem:[%s4150_s0 + $0x108] sm:$0xff] }
   0xe   :  { %v3546_v57 = vpack.c.bf16 %v2927_v56, %v2926_v55  ;;  %v3549_v60 = vpack.c.bf16 %v2935_v59, %v2934_v58  ;;  %v2936_v61 = vld [vmem:[%s4150_s0 + $0x110] sm:$0xff]  ;;  %v2937_v62 = vld [vmem:[%s4150_s0 + $0x118] sm:$0xff]  ;;  %v2944_v1 = vld [vmem:[%s4150_s0 + $0x120] sm:$0xff] }
   0xf   :  { %v3552_v63 = vpack.c.bf16 %v2937_v62, %v2936_v61  ;;  %v2945_v2 = vld [vmem:[%s4150_s0 + $0x128] sm:$0xff]  ;;  %v2946_v5 = vld [vmem:[%s4150_s0 + $0x130] sm:$0xff]  ;;  %v2947_v6 = vld [vmem:[%s4150_s0 + $0x138] sm:$0xff] }
  0x10   :  { %v3555_v3 = vpack.c.bf16 %v2945_v2, %v2944_v1  ;;  %v3558_v7 = vpack.c.bf16 %v2947_v6, %v2946_v5  ;;  %v2954_v10 = vld [vmem:[%s4150_s0 + $0x140] sm:$0xff]  ;;  %v2955_v11 = vld [vmem:[%s4150_s0 + $0x148] sm:$0xff]  ;;  %v2966_v23 = vld [vmem:[%s4150_s0 + $0x170] sm:$0xff] }
  0x11   :  { %v2964_v19 = vld [vmem:[%s4150_s0 + $0x160] sm:$0xff]  ;;  %v2976_v29 = vld [vmem:[%s4150_s0 + $0x190] sm:$0xff] }
  0x12   :  { %v2974_v26 = vld [vmem:[%s4150_s0 + $0x180] sm:$0xff]  ;;  %v2986_v35 = vld [vmem:[%s4150_s0 + $0x1b0] sm:$0xff] }
  0x13   :  { %v2984_v32 = vld [vmem:[%s4150_s0 + $0x1a0] sm:$0xff]  ;;  %v2996_v41 = vld [vmem:[%s4150_s0 + $0x1d0] sm:$0xff] }
  0x14   :  { %v2994_v38 = vld [vmem:[%s4150_s0 + $0x1c0] sm:$0xff]  ;;  %v3006_v47 = vld [vmem:[%s4150_s0 + $0x1f0] sm:$0xff] }
  0x15   :  { %v3004_v44 = vld [vmem:[%s4150_s0 + $0x1e0] sm:$0xff] }
  0xde   :  { %v93_v12 = vpop.f32.mrb[0].mxu0 }
  0xdf   :  { %v3676_v13 = vmax.f32 %v93_v12, 0.0  ;;  %v3198_v14 = vpop.f32.mrb[1].mxu0  ;;  %v3561_v12 = vpack.c.bf16 %v2955_v11, %v2954_v10 }
  0xe0   :  { %v2956_v14 = vld [vmem:[%s4150_s0 + $0x150] sm:$0xff] }
  0xe1   :  { %3199 = vmatprep.subr.msk.mxu1 %vm111_vm3, %v3676_v13 }
  0xe2   :  { %3200 = vmatpush3.msk.msra.mxu1 %vm111_vm3, %v3676_v13 }
  0xe3   :  { %3202 = vmatmul.mubr.msk.f32.vlgmr.msra.gmra.mrb[0].mxu1 %vm98_vm2, %v3681_v15  ;;  %3506 = vmatprep.subr.bf16.mxu1 %v3615_v0 }
  0xe4   :  { %3508 = vmatpush3.bf16.msra.mxu1 %v3507_v16  ;;  %3204 = vmatprep.mubr.msk.f32.mxu1 %vm98_vm2, %v3688_v17  ;;  %v2957_v16 = vld [vmem:[%s4150_s0 + $0x158] sm:$0xff] }
  0xe5   :  { %3509 = vmatprep.subr.bf16.mxu1 %v3615_v0  ;;  %v3564_v18 = vpack.c.bf16 %v2957_v16, %v2956_v14 }
  0xe7   :  { %3205 = vmatmul.mubr.msk.f32.gmra.mrb[2].mxu1 %vm98_vm2, %v3706_v20 }
  0xe8   :  { %3511 = vmatpush3.bf16.msra.mxu1 %v3510_v21  ;;  %3215 = vmatprep.mubr.msk.f32.mxu1 %vm3616_vm0, %v3617_v4  ;;  %v2965_v21 = vld [vmem:[%s4150_s0 + $0x168] sm:$0xff] }
  0xe9   :  { %3512 = vmatprep.subr.bf16.mxu1 %v3615_v0  ;;  %v3567_v22 = vpack.c.bf16 %v2965_v21, %v2964_v19 }
  0xeb   :  { %3216 = vmatmul.mubr.msk.f32.vlgmr.msra.gmra.mrb[4].mxu1 %vm23_vm1, %v3657_v8 }
  0xec   :  { %3514 = vmatpush3.bf16.msra.mxu1 %v3513_v24  ;;  %3234 = vmatprep.mubr.msk.f32.mxu1 %vm3616_vm0, %v3617_v4  ;;  %v2967_v24 = vld [vmem:[%s4150_s0 + $0x178] sm:$0xff] }
  0xed   :  { %3515 = vmatprep.subr.bf16.mxu1 %v3615_v0  ;;  %v3570_v25 = vpack.c.bf16 %v2967_v24, %v2966_v23 }
  0xf0   :  { %3517 = vmatpush3.bf16.msra.mxu1 %v3516_v27  ;;  %v2975_v27 = vld [vmem:[%s4150_s0 + $0x188] sm:$0xff] }
  0xf1   :  { %3518 = vmatprep.subr.bf16.mxu1 %v3615_v0  ;;  %v3573_v28 = vpack.c.bf16 %v2975_v27, %v2974_v26 }
  0xf3   :  { %3235 = vmatmul.mubr.msk.f32.vlgmr.msra.gmra.mrb[6].mxu1 %vm23_vm1, %v3657_v8 }
  0xf4   :  { %3520 = vmatpush3.bf16.msra.mxu1 %v3519_v30  ;;  %3253 = vmatprep.mubr.msk.f32.mxu1 %vm3616_vm0, %v3617_v4  ;;  %v2977_v30 = vld [vmem:[%s4150_s0 + $0x198] sm:$0xff] }
  0xf5   :  { %3521 = vmatprep.subr.bf16.mxu1 %v3615_v0  ;;  %v3576_v31 = vpack.c.bf16 %v2977_v30, %v2976_v29 }
  0xf8   :  { %3523 = vmatpush3.bf16.msra.mxu1 %v3522_v33  ;;  %v2985_v33 = vld [vmem:[%s4150_s0 + $0x1a8] sm:$0xff] }
  0xf9   :  { %3524 = vmatprep.subr.bf16.mxu1 %v3615_v0  ;;  %v3579_v34 = vpack.c.bf16 %v2985_v33, %v2984_v32 }
  0xfb   :  { %3254 = vmatmul.mubr.msk.f32.vlgmr.msra.gmra.mrb[8].mxu1 %vm23_vm1, %v3657_v8 }
  0xfc   :  { %3526 = vmatpush3.bf16.msra.mxu1 %v3525_v36  ;;  %3272 = vmatprep.mubr.msk.f32.mxu1 %vm3616_vm0, %v3617_v4  ;;  %v2987_v36 = vld [vmem:[%s4150_s0 + $0x1b8] sm:$0xff] }
  0xfd   :  { %3527 = vmatprep.subr.bf16.mxu1 %v3615_v0  ;;  %v3582_v37 = vpack.c.bf16 %v2987_v36, %v2986_v35 }
 0x100   :  { %3529 = vmatpush3.bf16.msra.mxu1 %v3528_v39  ;;  %v2995_v39 = vld [vmem:[%s4150_s0 + $0x1c8] sm:$0xff] }
 0x101   :  { %3530 = vmatprep.subr.bf16.mxu1 %v3615_v0  ;;  %v3585_v40 = vpack.c.bf16 %v2995_v39, %v2994_v38 }
 0x103   :  { %3273 = vmatmul.mubr.msk.f32.vlgmr.msra.gmra.mrb[10].mxu1 %vm23_vm1, %v3657_v8 }
 0x104   :  { %3532 = vmatpush3.bf16.msra.mxu1 %v3531_v42  ;;  %3291 = vmatprep.mubr.msk.f32.mxu1 %vm3616_vm0, %v3617_v4  ;;  %v2997_v42 = vld [vmem:[%s4150_s0 + $0x1d8] sm:$0xff] }
 0x105   :  { %3533 = vmatprep.subr.bf16.mxu1 %v3615_v0  ;;  %v3588_v43 = vpack.c.bf16 %v2997_v42, %v2996_v41 }
 0x108   :  { %3535 = vmatpush3.bf16.msra.mxu1 %v3534_v45  ;;  %v3005_v45 = vld [vmem:[%s4150_s0 + $0x1e8] sm:$0xff] }
 0x109   :  { %3536 = vmatprep.subr.bf16.mxu1 %v3615_v0  ;;  %v3591_v46 = vpack.c.bf16 %v3005_v45, %v3004_v44 }
 0x10b   :  { %3292 = vmatmul.mubr.msk.f32.vlgmr.msra.gmra.mrb[12].mxu1 %vm23_vm1, %v3657_v8 }
 0x10c   :  { %3538 = vmatpush3.bf16.msra.mxu1 %v3537_v48  ;;  %3310 = vmatprep.mubr.msk.f32.mxu1 %vm3616_vm0, %v3617_v4  ;;  %v3007_v48 = vld [vmem:[%s4150_s0 + $0x1f8] sm:$0xff] }
 0x10d   :  { %3539 = vmatprep.subr.bf16.mxu1 %v3615_v0  ;;  %v3594_v49 = vpack.c.bf16 %v3007_v48, %v3006_v47 }
 0x110   :  { %3541 = vmatpush3.bf16.msra.mxu1 %v3540_v51 }
 0x111   :  { %3542 = vmatprep.subr.bf16.mxu1 %v3615_v0 }
 0x113   :  { %3311 = vmatmul.mubr.msk.f32.vlgmr.msra.gmra.mrb[14].mxu1 %vm23_vm1, %v3657_v8 }
 0x114   :  { %3544 = vmatpush3.bf16.msra.mxu1 %v3543_v54  ;;  %3329 = vmatprep.mubr.msk.f32.mxu1 %vm3616_vm0, %v3617_v4 }
 0x115   :  { %3545 = vmatprep.subr.bf16.mxu1 %v3615_v0 }
 0x118   :  { %3547 = vmatpush3.bf16.msra.mxu1 %v3546_v57 }
 0x119   :  { %3548 = vmatprep.subr.bf16.mxu1 %v3615_v0 }
 0x11b   :  { %3330 = vmatmul.mubr.msk.f32.vlgmr.msra.gmra.mrb[16].mxu1 %vm23_vm1, %v3657_v8 }
 0x11c   :  { %3550 = vmatpush3.bf16.msra.mxu1 %v3549_v60  ;;  %3348 = vmatprep.mubr.msk.f32.mxu1 %vm3616_vm0, %v3617_v4 }
 0x11d   :  { %3551 = vmatprep.subr.bf16.mxu1 %v3615_v0 }
 0x120   :  { %3553 = vmatpush3.bf16.msra.mxu1 %v3552_v63 }
 0x121   :  { %3554 = vmatprep.subr.bf16.mxu1 %v3615_v0 }
 0x123   :  { %3349 = vmatmul.mubr.msk.f32.vlgmr.msra.gmra.mrb[18].mxu1 %vm23_vm1, %v3657_v8 }
 0x124   :  { %3556 = vmatpush3.bf16.msra.mxu1 %v3555_v3  ;;  %3367 = vmatprep.mubr.msk.f32.mxu1 %vm3616_vm0, %v3617_v4 }
 0x125   :  { %3557 = vmatprep.subr.bf16.mxu1 %v3615_v0 }
 0x128   :  { %3559 = vmatpush3.bf16.msra.mxu1 %v3558_v7 }
 0x129   :  { %3560 = vmatprep.subr.bf16.mxu1 %v3615_v0 }
 0x12b   :  { %3368 = vmatmul.mubr.msk.f32.vlgmr.msra.gmra.mrb[20].mxu1 %vm23_vm1, %v3657_v8 }
 0x12c   :  { %3562 = vmatpush3.bf16.msra.mxu1 %v3561_v12  ;;  %3386 = vmatprep.mubr.msk.f32.mxu1 %vm3616_vm0, %v3617_v4 }
 0x12d   :  { %3563 = vmatprep.subr.bf16.mxu1 %v3615_v0 }
 0x130   :  { %3565 = vmatpush3.bf16.msra.mxu1 %v3564_v18 }
 0x131   :  { %3566 = vmatprep.subr.bf16.mxu1 %v3615_v0 }
 0x133   :  { %3387 = vmatmul.mubr.msk.f32.vlgmr.msra.gmra.mrb[22].mxu1 %vm23_vm1, %v3657_v8 }
 0x134   :  { %3568 = vmatpush3.bf16.msra.mxu1 %v3567_v22  ;;  %3405 = vmatprep.mubr.msk.f32.mxu1 %vm3616_vm0, %v3617_v4 }
 0x135   :  { %3569 = vmatprep.subr.bf16.mxu1 %v3615_v0 }
 0x138   :  { %3571 = vmatpush3.bf16.msra.mxu1 %v3570_v25 }
 0x139   :  { %3572 = vmatprep.subr.bf16.mxu1 %v3615_v0 }
 0x13b   :  { %3406 = vmatmul.mubr.msk.f32.vlgmr.msra.gmra.mrb[24].mxu1 %vm23_vm1, %v3657_v8 }
 0x13c   :  { %3574 = vmatpush3.bf16.msra.mxu1 %v3573_v28  ;;  %3424 = vmatprep.mubr.msk.f32.mxu1 %vm3616_vm0, %v3617_v4 }
 0x13d   :  { %3575 = vmatprep.subr.bf16.mxu1 %v3615_v0 }
 0x140   :  { %3577 = vmatpush3.bf16.msra.mxu1 %v3576_v31 }
 0x141   :  { %3578 = vmatprep.subr.bf16.mxu1 %v3615_v0 }
 0x143   :  { %3425 = vmatmul.mubr.msk.f32.vlgmr.msra.gmra.mrb[26].mxu1 %vm23_vm1, %v3657_v8 }
 0x144   :  { %3580 = vmatpush3.bf16.msra.mxu1 %v3579_v34  ;;  %3443 = vmatprep.mubr.msk.f32.mxu1 %vm3616_vm0, %v3617_v4 }
 0x145   :  { %3581 = vmatprep.subr.bf16.mxu1 %v3615_v0 }
 0x148   :  { %3583 = vmatpush3.bf16.msra.mxu1 %v3582_v37 }
 0x149   :  { %3584 = vmatprep.subr.bf16.mxu1 %v3615_v0 }
 0x14b   :  { %3444 = vmatmul.mubr.msk.f32.vlgmr.msra.gmra.mrb[28].mxu1 %vm23_vm1, %v3657_v8 }
 0x14c   :  { %3586 = vmatpush3.bf16.msra.mxu1 %v3585_v40  ;;  %3462 = vmatprep.mubr.msk.f32.mxu1 %vm3616_vm0, %v3617_v4 }
 0x14d   :  { %3587 = vmatprep.subr.bf16.mxu1 %v3615_v0 }
 0x150   :  { %3589 = vmatpush3.bf16.msra.mxu1 %v3588_v43 }
 0x151   :  { %3590 = vmatprep.subr.bf16.mxu1 %v3615_v0 }
 0x153   :  { %3463 = vmatmul.mubr.msk.f32.vlgmr.msra.gmra.mrb[30].mxu1 %vm23_vm1, %v3657_v8 }
 0x154   :  { %3592 = vmatpush3.bf16.msra.mxu1 %v3591_v46  ;;  %3481 = vmatprep.mubr.msk.f32.mxu1 %vm3616_vm0, %v3617_v4 }
 0x155   :  { %3593 = vmatprep.subr.bf16.mxu1 %v3615_v0 }
 0x158   :  { %3595 = vmatpush3.bf16.msra.mxu1 %v3594_v49 }
 0x15b   :  { %3482 = vmatmul.mubr.msk.f32.vlgmr.msra.gmra.mrb[32].mxu1 %vm23_vm1, %v3657_v8 }
 0x15c   :  { %3494 = vmatprep.mubr.msk.f32.mxu1 %vm98_vm2, %v3664_v9 }
 0x1b6   :  { %v3969_v50 = vpop.f32.mrb[0].mxu1 }
 0x1b7   :  { %v3971_v51 = vpop.f32.mrb[1].mxu1 }
 0x1ba   :  { %v3973_v52 = vpop.f32.mrb[2].mxu1 }
 0x1bb   :  { %v3975_v53 = vpop.f32.mrb[3].mxu1 }
 0x1be   :  { %v272_v54 = vpop.f32.mrb[4].mxu1 }
 0x1bf   :  { %v276_v55 = vmax.f32 %v272_v54, 0.0  ;;  %v3217_v4 = vpop.f32.mrb[5].mxu1 }
 0x1c1   :  { %3218 = vmatprep.subr.msk.mxu0 %vm111_vm3, %v276_v55  ;;  %v365_v8 = vadd.f32 %v276_v55, %v3676_v13 }
 0x1c2   :  { %3219 = vmatpush3.msk.msra.mxu0 %vm111_vm3, %v276_v55 }
 0x1c3   :  { %3221 = vmatmul.mubr.msk.f32.vlgmr.msra.gmra.mrb[2].mxu0 %vm98_vm2, %v3681_v15 }
 0x1c4   :  { %3223 = vmatprep.mubr.msk.f32.mxu0 %vm98_vm2, %v3688_v17 }
 0x1c6   :  { %v441_v0 = vpop.f32.mrb[6].mxu1 }
 0x1c7   :  { %v445_v56 = vmax.f32 %v441_v0, 0.0  ;;  %3224 = vmatmul.mubr.msk.f32.gmra.mrb[4].mxu0 %vm98_vm2, %v3706_v20  ;;  %v3236_v57 = vpop.f32.mrb[7].mxu1 }
 0x1c8   :  { %3239 = vmatprep.mubr.msk.f32.mxu0 %vm98_vm2, %v3664_v9 }
 0x1c9   :  { %v534_v58 = vadd.f32 %v445_v56, %v365_v8  ;;  %3237 = vmatprep.subr.msk.mxu0 %vm111_vm3, %v445_v56 }
 0x1ca   :  { %3238 = vmatpush3.msk.msra.mxu0 %vm111_vm3, %v445_v56 }
 0x1cb   :  { %3240 = vmatmul.mubr.msk.f32.vlgmr.msra.gmra.mrb[6].mxu0 %vm98_vm2, %v3681_v15 }
 0x1cc   :  { %3242 = vmatprep.mubr.msk.f32.mxu0 %vm98_vm2, %v3688_v17 }
 0x1ce   :  { %v610_v13 = vpop.f32.mrb[8].mxu1 }
 0x1cf   :  { %v614_v59 = vmax.f32 %v610_v13, 0.0  ;;  %3243 = vmatmul.mubr.msk.f32.gmra.mrb[8].mxu0 %vm98_vm2, %v3706_v20  ;;  %v3255_v60 = vpop.f32.mrb[9].mxu1 }
 0x1d0   :  { %3258 = vmatprep.mubr.msk.f32.mxu0 %vm98_vm2, %v3664_v9 }
 0x1d1   :  { %v703_v61 = vadd.f32 %v614_v59, %v534_v58  ;;  %3256 = vmatprep.subr.msk.mxu0 %vm111_vm3, %v614_v59 }
 0x1d2   :  { %3257 = vmatpush3.msk.msra.mxu0 %vm111_vm3, %v614_v59 }
 0x1d3   :  { %3259 = vmatmul.mubr.msk.f32.vlgmr.msra.gmra.mrb[10].mxu0 %vm98_vm2, %v3681_v15 }
 0x1d4   :  { %3261 = vmatprep.mubr.msk.f32.mxu0 %vm98_vm2, %v3688_v17 }
 0x1d6   :  { %v779_v62 = vpop.f32.mrb[10].mxu1 }
 0x1d7   :  { %v783_v63 = vmax.f32 %v779_v62, 0.0  ;;  %3262 = vmatmul.mubr.msk.f32.gmra.mrb[12].mxu0 %vm98_vm2, %v3706_v20  ;;  %v3274_v1 = vpop.f32.mrb[11].mxu1 }
 0x1d8   :  { %3277 = vmatprep.mubr.msk.f32.mxu0 %vm98_vm2, %v3664_v9 }
 0x1d9   :  { %v872_v2 = vadd.f32 %v783_v63, %v703_v61  ;;  %3275 = vmatprep.subr.msk.mxu0 %vm111_vm3, %v783_v63 }
 0x1da   :  { %3276 = vmatpush3.msk.msra.mxu0 %vm111_vm3, %v783_v63 }
 0x1db   :  { %3278 = vmatmul.mubr.msk.f32.vlgmr.msra.gmra.mrb[14].mxu0 %vm98_vm2, %v3681_v15 }
 0x1dc   :  { %3280 = vmatprep.mubr.msk.f32.mxu0 %vm98_vm2, %v3688_v17 }
 0x1de   :  { %v948_v3 = vpop.f32.mrb[12].mxu1 }
 0x1df   :  { %v952_v5 = vmax.f32 %v948_v3, 0.0  ;;  %3281 = vmatmul.mubr.msk.f32.gmra.mrb[16].mxu0 %vm98_vm2, %v3706_v20  ;;  %v3293_v6 = vpop.f32.mrb[13].mxu1 }
 0x1e0   :  { %3296 = vmatprep.mubr.msk.f32.mxu0 %vm98_vm2, %v3664_v9 }
 0x1e1   :  { %v1041_v7 = vadd.f32 %v952_v5, %v872_v2  ;;  %3294 = vmatprep.subr.msk.mxu0 %vm111_vm3, %v952_v5 }
 0x1e2   :  { %3295 = vmatpush3.msk.msra.mxu0 %vm111_vm3, %v952_v5 }
 0x1e3   :  { %3297 = vmatmul.mubr.msk.f32.vlgmr.msra.gmra.mrb[18].mxu0 %vm98_vm2, %v3681_v15 }
 0x1e4   :  { %3299 = vmatprep.mubr.msk.f32.mxu0 %vm98_vm2, %v3688_v17 }
 0x1e6   :  { %v1117_v10 = vpop.f32.mrb[14].mxu1 }
 0x1e7   :  { %v1121_v11 = vmax.f32 %v1117_v10, 0.0  ;;  %3300 = vmatmul.mubr.msk.f32.gmra.mrb[20].mxu0 %vm98_vm2, %v3706_v20  ;;  %v3312_v12 = vpop.f32.mrb[15].mxu1 }
 0x1e8   :  { %3315 = vmatprep.mubr.msk.f32.mxu0 %vm98_vm2, %v3664_v9 }
 0x1e9   :  { %v1210_v14 = vadd.f32 %v1121_v11, %v1041_v7  ;;  %3313 = vmatprep.subr.msk.mxu0 %vm111_vm3, %v1121_v11 }
 0x1ea   :  { %3314 = vmatpush3.msk.msra.mxu0 %vm111_vm3, %v1121_v11 }
 0x1eb   :  { %3316 = vmatmul.mubr.msk.f32.vlgmr.msra.gmra.mrb[22].mxu0 %vm98_vm2, %v3681_v15 }
 0x1ec   :  { %3318 = vmatprep.mubr.msk.f32.mxu0 %vm98_vm2, %v3688_v17 }
 0x1ee   :  { %v1286_v16 = vpop.f32.mrb[16].mxu1 }
 0x1ef   :  { %v1290_v18 = vmax.f32 %v1286_v16, 0.0  ;;  %3319 = vmatmul.mubr.msk.f32.gmra.mrb[24].mxu0 %vm98_vm2, %v3706_v20  ;;  %v3331_v19 = vpop.f32.mrb[17].mxu1 }
 0x1f0   :  { %3334 = vmatprep.mubr.msk.f32.mxu0 %vm98_vm2, %v3664_v9 }
 0x1f1   :  { %v1379_v21 = vadd.f32 %v1290_v18, %v1210_v14  ;;  %3332 = vmatprep.subr.msk.mxu0 %vm111_vm3, %v1290_v18 }
 0x1f2   :  { %3333 = vmatpush3.msk.msra.mxu0 %vm111_vm3, %v1290_v18 }
 0x1f3   :  { %3335 = vmatmul.mubr.msk.f32.vlgmr.msra.gmra.mrb[26].mxu0 %vm98_vm2, %v3681_v15 }
 0x1f4   :  { %3337 = vmatprep.mubr.msk.f32.mxu0 %vm98_vm2, %v3688_v17 }
 0x1f6   :  { %v1455_v22 = vpop.f32.mrb[18].mxu1 }
 0x1f7   :  { %v1459_v23 = vmax.f32 %v1455_v22, 0.0  ;;  %3338 = vmatmul.mubr.msk.f32.gmra.mrb[28].mxu0 %vm98_vm2, %v3706_v20  ;;  %v3350_v24 = vpop.f32.mrb[19].mxu1 }
 0x1f8   :  { %3353 = vmatprep.mubr.msk.f32.mxu0 %vm98_vm2, %v3664_v9 }
 0x1f9   :  { %v1548_v25 = vadd.f32 %v1459_v23, %v1379_v21  ;;  %3351 = vmatprep.subr.msk.mxu0 %vm111_vm3, %v1459_v23 }
 0x1fa   :  { %3352 = vmatpush3.msk.msra.mxu0 %vm111_vm3, %v1459_v23 }
 0x1fb   :  { %3354 = vmatmul.mubr.msk.f32.vlgmr.msra.gmra.mrb[30].mxu0 %vm98_vm2, %v3681_v15 }
 0x1fc   :  { %3356 = vmatprep.mubr.msk.f32.mxu0 %vm98_vm2, %v3688_v17 }
 0x1fe   :  { %v1624_v26 = vpop.f32.mrb[20].mxu1 }
 0x1ff   :  { %v1628_v27 = vmax.f32 %v1624_v26, 0.0  ;;  %3357 = vmatmul.mubr.msk.f32.gmra.mrb[32].mxu0 %vm98_vm2, %v3706_v20  ;;  %v3369_v28 = vpop.f32.mrb[21].mxu1 }
 0x200   :  { %3372 = vmatprep.mubr.msk.f32.mxu0 %vm98_vm2, %v3664_v9 }
 0x201   :  { %v1717_v29 = vadd.f32 %v1628_v27, %v1548_v25  ;;  %3370 = vmatprep.subr.msk.mxu0 %vm111_vm3, %v1628_v27 }
 0x202   :  { %3371 = vmatpush3.msk.msra.mxu0 %vm111_vm3, %v1628_v27 }
 0x203   :  { %3373 = vmatmul.mubr.msk.f32.vlgmr.msra.gmra.mrb[34].mxu0 %vm98_vm2, %v3681_v15 }
 0x204   :  { %3375 = vmatprep.mubr.msk.f32.mxu0 %vm98_vm2, %v3688_v17 }
 0x206   :  { %v1793_v30 = vpop.f32.mrb[22].mxu1 }
 0x207   :  { %v1797_v31 = vmax.f32 %v1793_v30, 0.0  ;;  %3376 = vmatmul.mubr.msk.f32.gmra.mrb[36].mxu0 %vm98_vm2, %v3706_v20  ;;  %v3388_v32 = vpop.f32.mrb[23].mxu1 }
 0x208   :  { %3391 = vmatprep.mubr.msk.f32.mxu0 %vm98_vm2, %v3664_v9 }
 0x209   :  { %v1886_v33 = vadd.f32 %v1797_v31, %v1717_v29  ;;  %3389 = vmatprep.subr.msk.mxu0 %vm111_vm3, %v1797_v31 }
 0x20a   :  { %3390 = vmatpush3.msk.msra.mxu0 %vm111_vm3, %v1797_v31 }
 0x20b   :  { %3392 = vmatmul.mubr.msk.f32.vlgmr.msra.gmra.mrb[38].mxu0 %vm98_vm2, %v3681_v15 }
 0x20c   :  { %3394 = vmatprep.mubr.msk.f32.mxu0 %vm98_vm2, %v3688_v17 }
 0x20e   :  { %v1962_v34 = vpop.f32.mrb[24].mxu1 }
 0x20f   :  { %v1966_v35 = vmax.f32 %v1962_v34, 0.0  ;;  %3395 = vmatmul.mubr.msk.f32.gmra.mrb[40].mxu0 %vm98_vm2, %v3706_v20  ;;  %v3407_v36 = vpop.f32.mrb[25].mxu1 }
 0x210   :  { %3410 = vmatprep.mubr.msk.f32.mxu0 %vm98_vm2, %v3664_v9 }
 0x211   :  { %v2055_v37 = vadd.f32 %v1966_v35, %v1886_v33  ;;  %3408 = vmatprep.subr.msk.mxu0 %vm111_vm3, %v1966_v35 }
 0x212   :  { %3409 = vmatpush3.msk.msra.mxu0 %vm111_vm3, %v1966_v35 }
 0x213   :  { %3411 = vmatmul.mubr.msk.f32.vlgmr.msra.gmra.mrb[42].mxu0 %vm98_vm2, %v3681_v15 }
 0x214   :  { %3413 = vmatprep.mubr.msk.f32.mxu0 %vm98_vm2, %v3688_v17 }
 0x216   :  { %v2131_v38 = vpop.f32.mrb[26].mxu1 }
 0x217   :  { %v2135_v39 = vmax.f32 %v2131_v38, 0.0  ;;  %3414 = vmatmul.mubr.msk.f32.gmra.mrb[44].mxu0 %vm98_vm2, %v3706_v20  ;;  %v3426_v40 = vpop.f32.mrb[27].mxu1 }
 0x218   :  { %3429 = vmatprep.mubr.msk.f32.mxu0 %vm98_vm2, %v3664_v9 }
 0x219   :  { %v2224_v41 = vadd.f32 %v2135_v39, %v2055_v37  ;;  %3427 = vmatprep.subr.msk.mxu0 %vm111_vm3, %v2135_v39 }
 0x21a   :  { %3428 = vmatpush3.msk.msra.mxu0 %vm111_vm3, %v2135_v39 }
 0x21b   :  { %3430 = vmatmul.mubr.msk.f32.vlgmr.msra.gmra.mrb[46].mxu0 %vm98_vm2, %v3681_v15 }
 0x21c   :  { %3432 = vmatprep.mubr.msk.f32.mxu0 %vm98_vm2, %v3688_v17 }
 0x21e   :  { %v2300_v42 = vpop.f32.mrb[28].mxu1 }
 0x21f   :  { %v2304_v43 = vmax.f32 %v2300_v42, 0.0  ;;  %3433 = vmatmul.mubr.msk.f32.gmra.mrb[48].mxu0 %vm98_vm2, %v3706_v20  ;;  %v3445_v44 = vpop.f32.mrb[29].mxu1 }
 0x220   :  { %3448 = vmatprep.mubr.msk.f32.mxu0 %vm98_vm2, %v3664_v9 }
 0x221   :  { %v2393_v45 = vadd.f32 %v2304_v43, %v2224_v41  ;;  %3446 = vmatprep.subr.msk.mxu0 %vm111_vm3, %v2304_v43 }
 0x222   :  { %3447 = vmatpush3.msk.msra.mxu0 %vm111_vm3, %v2304_v43 }
 0x223   :  { %3449 = vmatmul.mubr.msk.f32.vlgmr.msra.gmra.mrb[50].mxu0 %vm98_vm2, %v3681_v15 }
 0x224   :  { %3451 = vmatprep.mubr.msk.f32.mxu0 %vm98_vm2, %v3688_v17 }
 0x226   :  { %v2469_v46 = vpop.f32.mrb[30].mxu1 }
 0x227   :  { %v2473_v47 = vmax.f32 %v2469_v46, 0.0  ;;  %3452 = vmatmul.mubr.msk.f32.gmra.mrb[52].mxu0 %vm98_vm2, %v3706_v20  ;;  %v3464_v48 = vpop.f32.mrb[31].mxu1 }
 0x228   :  { %3467 = vmatprep.mubr.msk.f32.mxu0 %vm98_vm2, %v3664_v9 }
 0x229   :  { %v2562_v49 = vadd.f32 %v2473_v47, %v2393_v45  ;;  %3465 = vmatprep.subr.msk.mxu0 %vm111_vm3, %v2473_v47 }
 0x22a   :  { %3466 = vmatpush3.msk.msra.mxu0 %vm111_vm3, %v2473_v47 }
 0x22b   :  { %3468 = vmatmul.mubr.msk.f32.vlgmr.msra.gmra.mrb[54].mxu0 %vm98_vm2, %v3681_v15 }
 0x22c   :  { %3470 = vmatprep.mubr.msk.f32.mxu0 %vm98_vm2, %v3688_v17 }
 0x22e   :  { %v2638_v54 = vpop.f32.mrb[32].mxu1 }
 0x22f   :  { %v2642_v55 = vmax.f32 %v2638_v54, 0.0  ;;  %3471 = vmatmul.mubr.msk.f32.gmra.mrb[56].mxu0 %vm98_vm2, %v3706_v20  ;;  %v3483_v4 = vpop.f32.mrb[33].mxu1 }
 0x230   :  { %3486 = vmatprep.mubr.msk.f32.mxu0 %vm98_vm2, %v3664_v9 }
 0x231   :  { %v2731_v0 = vadd.f32 %v2642_v55, %v2562_v49  ;;  %3484 = vmatprep.subr.msk.mxu0 %vm111_vm3, %v2642_v55 }
 0x232   :  { %3485 = vmatpush3.msk.msra.mxu0 %vm111_vm3, %v2642_v55 }
 0x233   :  { %v2736_v8 = vmul.f32 0.0625, %v2731_v0  ;;  %3487 = vmatmul.mubr.msk.f32.vlgmr.msra.gmra.mrb[58].mxu0 %vm98_vm2, %v3681_v15 }
 0x234   :  { %3489 = vmatprep.mubr.msk.f32.mxu0 %vm98_vm2, %v3688_v17 }
 0x235   :  { %3492 = vmatprep.subr.msk.mxu1 %vm111_vm3, %v2736_v8 }
 0x236   :  { %3493 = vmatpush3.msk.msra.mxu1 %vm111_vm3, %v2736_v8 }
 0x237   :  { %3490 = vmatmul.mubr.msk.f32.gmra.mrb[60].mxu0 %vm98_vm2, %v3706_v20  ;;  %3495 = vmatmul.mubr.msk.f32.vlgmr.msra.gmra.mrb[34].mxu1 %vm98_vm2, %v3681_v15 }
 0x238   :  { %3497 = vmatprep.mubr.msk.f32.mxu1 %vm98_vm2, %v3688_v17 }
 0x23b   :  { %3498 = vmatmul.mubr.msk.f32.gmra.mrb[36].mxu1 %vm98_vm2, %v3706_v20 }
 0x296   :  { %v3222_v9 = vpop.f32.mrb[2].mxu0 }
 0x297   :  { %v367_v56 = vmax.f32 %v3969_v50, %v3222_v9  ;;  %v346_v57 = vpop.f32.mrb[3].mxu0 }
 0x298   :  { %v366_v58 = vmax.f32 %v3971_v51, %v346_v57 }
 0x29a   :  { %v3225_v13 = vpop.f32.mrb[4].mxu0 }
 0x29b   :  { %v369_v59 = vmax.f32 %v3973_v52, %v3225_v13  ;;  %v356_v60 = vpop.f32.mrb[5].mxu0 }
 0x29c   :  { %v368_v61 = vmax.f32 %v3975_v53, %v356_v60 }
 0x29e   :  { %v3241_v62 = vpop.f32.mrb[6].mxu0 }
 0x29f   :  { %v536_v15 = vmax.f32 %v367_v56, %v3241_v62  ;;  %v515_v63 = vpop.f32.mrb[7].mxu0 }
 0x2a0   :  { %v535_v1 = vmax.f32 %v366_v58, %v515_v63 }
 0x2a2   :  { %v3244_v17 = vpop.f32.mrb[8].mxu0 }
 0x2a3   :  { %v538_v2 = vmax.f32 %v369_v59, %v3244_v17  ;;  %v525_v3 = vpop.f32.mrb[9].mxu0 }
 0x2a4   :  { %v537_v20 = vmax.f32 %v368_v61, %v525_v3 }
 0x2a6   :  { %v3260_v5 = vpop.f32.mrb[10].mxu0 }
 0x2a7   :  { %v705_v6 = vmax.f32 %v536_v15, %v3260_v5  ;;  %v684_v50 = vpop.f32.mrb[11].mxu0 }
 0x2a8   :  { %v704_v7 = vmax.f32 %v535_v1, %v684_v50 }
 0x2aa   :  { %v3263_v10 = vpop.f32.mrb[12].mxu0 }
 0x2ab   :  { %v707_v51 = vmax.f32 %v538_v2, %v3263_v10  ;;  %v694_v11 = vpop.f32.mrb[13].mxu0 }
 0x2ac   :  { %v706_v12 = vmax.f32 %v537_v20, %v694_v11 }
 0x2ae   :  { %v3279_v52 = vpop.f32.mrb[14].mxu0 }
 0x2af   :  { %v874_v14 = vmax.f32 %v705_v6, %v3279_v52  ;;  %v853_v16 = vpop.f32.mrb[15].mxu0 }
 0x2b0   :  { %v873_v53 = vmax.f32 %v704_v7, %v853_v16 }
 0x2b2   :  { %v3282_v18 = vpop.f32.mrb[16].mxu0 }
 0x2b3   :  { %v876_v19 = vmax.f32 %v707_v51, %v3282_v18  ;;  %v863_v21 = vpop.f32.mrb[17].mxu0 }
 0x2b4   :  { %v875_v22 = vmax.f32 %v706_v12, %v863_v21 }
 0x2b6   :  { %v3298_v23 = vpop.f32.mrb[18].mxu0 }
 0x2b7   :  { %v1043_v24 = vmax.f32 %v874_v14, %v3298_v23  ;;  %v1022_v25 = vpop.f32.mrb[19].mxu0 }
 0x2b8   :  { %v1042_v26 = vmax.f32 %v873_v53, %v1022_v25 }
 0x2ba   :  { %v3301_v27 = vpop.f32.mrb[20].mxu0 }
 0x2bb   :  { %v1045_v28 = vmax.f32 %v876_v19, %v3301_v27  ;;  %v1032_v29 = vpop.f32.mrb[21].mxu0 }
 0x2bc   :  { %v1044_v30 = vmax.f32 %v875_v22, %v1032_v29 }
 0x2be   :  { %v3317_v31 = vpop.f32.mrb[22].mxu0 }
 0x2bf   :  { %v1212_v32 = vmax.f32 %v1043_v24, %v3317_v31  ;;  %v1191_v33 = vpop.f32.mrb[23].mxu0 }
 0x2c0   :  { %v1211_v34 = vmax.f32 %v1042_v26, %v1191_v33 }
 0x2c2   :  { %v3320_v35 = vpop.f32.mrb[24].mxu0 }
 0x2c3   :  { %v1214_v36 = vmax.f32 %v1045_v28, %v3320_v35  ;;  %v1201_v37 = vpop.f32.mrb[25].mxu0 }
 0x2c4   :  { %v1213_v38 = vmax.f32 %v1044_v30, %v1201_v37 }
 0x2c6   :  { %v3336_v39 = vpop.f32.mrb[26].mxu0 }
 0x2c7   :  { %v1381_v40 = vmax.f32 %v1212_v32, %v3336_v39  ;;  %v1360_v41 = vpop.f32.mrb[27].mxu0 }
 0x2c8   :  { %v1380_v42 = vmax.f32 %v1211_v34, %v1360_v41 }
 0x2ca   :  { %v3339_v43 = vpop.f32.mrb[28].mxu0 }
 0x2cb   :  { %v1383_v44 = vmax.f32 %v1214_v36, %v3339_v43  ;;  %v1370_v45 = vpop.f32.mrb[29].mxu0 }
 0x2cc   :  { %v1382_v46 = vmax.f32 %v1213_v38, %v1370_v45 }
 0x2ce   :  { %v3355_v47 = vpop.f32.mrb[30].mxu0 }
 0x2cf   :  { %v1550_v48 = vmax.f32 %v1381_v40, %v3355_v47  ;;  %v1529_v49 = vpop.f32.mrb[31].mxu0 }
 0x2d0   :  { %v1549_v54 = vmax.f32 %v1380_v42, %v1529_v49 }
 0x2d2   :  { %v3358_v55 = vpop.f32.mrb[32].mxu0 }
 0x2d3   :  { %v1552_v4 = vmax.f32 %v1383_v44, %v3358_v55  ;;  %v1539_v0 = vpop.f32.mrb[33].mxu0 }
 0x2d4   :  { %v1551_v8 = vmax.f32 %v1382_v46, %v1539_v0 }
 0x2d6   :  { %v3374_v9 = vpop.f32.mrb[34].mxu0 }
 0x2d7   :  { %v1719_v56 = vmax.f32 %v1550_v48, %v3374_v9  ;;  %v1698_v57 = vpop.f32.mrb[35].mxu0 }
 0x2d8   :  { %v1718_v58 = vmax.f32 %v1549_v54, %v1698_v57 }
 0x2da   :  { %v3377_v13 = vpop.f32.mrb[36].mxu0 }
 0x2db   :  { %v1721_v59 = vmax.f32 %v1552_v4, %v3377_v13  ;;  %v1708_v60 = vpop.f32.mrb[37].mxu0 }
 0x2dc   :  { %v1720_v61 = vmax.f32 %v1551_v8, %v1708_v60 }
 0x2de   :  { %v3393_v62 = vpop.f32.mrb[38].mxu0 }
 0x2df   :  { %v1888_v15 = vmax.f32 %v1719_v56, %v3393_v62  ;;  %v1867_v63 = vpop.f32.mrb[39].mxu0 }
 0x2e0   :  { %v1887_v1 = vmax.f32 %v1718_v58, %v1867_v63 }
 0x2e2   :  { %v3396_v17 = vpop.f32.mrb[40].mxu0 }
 0x2e3   :  { %v1890_v2 = vmax.f32 %v1721_v59, %v3396_v17  ;;  %v1877_v3 = vpop.f32.mrb[41].mxu0 }
 0x2e4   :  { %v1889_v20 = vmax.f32 %v1720_v61, %v1877_v3 }
 0x2e6   :  { %v3412_v5 = vpop.f32.mrb[42].mxu0 }
 0x2e7   :  { %v2057_v6 = vmax.f32 %v1888_v15, %v3412_v5  ;;  %v2036_v50 = vpop.f32.mrb[43].mxu0 }
 0x2e8   :  { %v2056_v7 = vmax.f32 %v1887_v1, %v2036_v50 }
 0x2ea   :  { %v3415_v10 = vpop.f32.mrb[44].mxu0 }
 0x2eb   :  { %v2059_v51 = vmax.f32 %v1890_v2, %v3415_v10  ;;  %v2046_v11 = vpop.f32.mrb[45].mxu0 }
 0x2ec   :  { %v2058_v12 = vmax.f32 %v1889_v20, %v2046_v11 }
 0x2ee   :  { %v3431_v52 = vpop.f32.mrb[46].mxu0 }
 0x2ef   :  { %v2226_v14 = vmax.f32 %v2057_v6, %v3431_v52  ;;  %v2205_v16 = vpop.f32.mrb[47].mxu0 }
 0x2f0   :  { %v2225_v53 = vmax.f32 %v2056_v7, %v2205_v16 }
 0x2f2   :  { %v3434_v18 = vpop.f32.mrb[48].mxu0 }
 0x2f3   :  { %v2228_v19 = vmax.f32 %v2059_v51, %v3434_v18  ;;  %v2215_v21 = vpop.f32.mrb[49].mxu0 }
 0x2f4   :  { %v2227_v22 = vmax.f32 %v2058_v12, %v2215_v21 }
 0x2f6   :  { %v3450_v23 = vpop.f32.mrb[50].mxu0 }
 0x2f7   :  { %v2395_v24 = vmax.f32 %v2226_v14, %v3450_v23  ;;  %v2374_v25 = vpop.f32.mrb[51].mxu0 }
 0x2f8   :  { %v2394_v26 = vmax.f32 %v2225_v53, %v2374_v25 }
 0x2fa   :  { %v3453_v27 = vpop.f32.mrb[52].mxu0 }
 0x2fb   :  { %v2397_v28 = vmax.f32 %v2228_v19, %v3453_v27  ;;  %v2384_v29 = vpop.f32.mrb[53].mxu0 }
 0x2fc   :  { %v2396_v30 = vmax.f32 %v2227_v22, %v2384_v29 }
 0x2fe   :  { %v3469_v31 = vpop.f32.mrb[54].mxu0 }
 0x2ff   :  { %v2564_v32 = vmax.f32 %v2395_v24, %v3469_v31  ;;  %v2543_v33 = vpop.f32.mrb[55].mxu0 }
 0x300   :  { %v2563_v34 = vmax.f32 %v2394_v26, %v2543_v33 }
 0x302   :  { %v3472_v35 = vpop.f32.mrb[56].mxu0 }
 0x303   :  { %v2566_v36 = vmax.f32 %v2397_v28, %v3472_v35  ;;  %v2553_v37 = vpop.f32.mrb[57].mxu0 }
 0x304   :  { %v2565_v38 = vmax.f32 %v2396_v30, %v2553_v37 }
 0x306   :  { %v3488_v39 = vpop.f32.mrb[58].mxu0 }
 0x307   :  { %v2733_v40 = vmax.f32 %v2564_v32, %v3488_v39  ;;  %v2712_v41 = vpop.f32.mrb[59].mxu0 }
 0x308   :  { %v2732_v42 = vmax.f32 %v2563_v34, %v2712_v41 }
 0x30a   :  { %v3491_v43 = vpop.f32.mrb[60].mxu0  ;;  %v3496_v44 = vpop.f32.mrb[34].mxu1 }
 0x30b   :  { %v2735_v45 = vmax.f32 %v2566_v36, %v3491_v43  ;;  %v2812_v46 = vadd.f32 %v3496_v44, %v2733_v40  ;;  %v2722_v47 = vpop.f32.mrb[61].mxu0  ;;  %v2806_v48 = vpop.f32.mrb[35].mxu1 }
 0x30c   :  { %v2734_v49 = vmax.f32 %v2565_v38, %v2722_v47  ;;  %v2807_v54 = vadd.f32 %v2806_v48, %v2732_v42 }
 0x30d   :  { %v3020_v55 = vmul.f32 -1.442695, %v2812_v46 }
 0x30e   :  { %v3019_v4 = vmul.f32 -1.442695, %v2807_v54  ;;  %v3499_v0 = vpop.f32.mrb[36].mxu1 }
 0x30f   :  { %3599 = vpow2.f32 %v3020_v55  ;;  %v2822_v8 = vadd.f32 %v3499_v0, %v2735_v45  ;;  %v2816_v9 = vpop.f32.mrb[37].mxu1 }
 0x310   :  { %3601 = vpow2.f32 %v3019_v4  ;;  %v2817_v56 = vadd.f32 %v2816_v9, %v2734_v49 }
 0x311   :  { %v3022_v57 = vmul.f32 -1.442695, %v2822_v8 }
 0x312   :  { %v3021_v58 = vmul.f32 -1.442695, %v2817_v56 }
 0x313   :  { %3603 = vpow2.f32 %v3022_v57 }
 0x314   :  { %3605 = vpow2.f32 %v3021_v58 }
 0x319   :  { %v3600_v13 = vpop.eup %3599 }
 0x31a   :  { %v3602_v59 = vpop.eup %3601  ;;  %v2838_v60 = vadd.f32 1.0, %v3600_v13 }
 0x31b   :  { %v2837_v61 = vadd.f32 1.0, %v3602_v59 }
 0x31c   :  { %3607 = vrcp.f32 %v2838_v60 }
 0x31d   :  { %v3604_v62 = vpop.eup %3603  ;;  %3609 = vrcp.f32 %v2837_v61 }
 0x31e   :  { %v3606_v15 = vpop.eup %3605  ;;  %v2840_v63 = vadd.f32 1.0, %v3604_v62 }
 0x31f   :  { %v2839_v1 = vadd.f32 1.0, %v3606_v15 }
 0x320   :  { %3611 = vrcp.f32 %v2840_v63 }
 0x321   :  { %3613 = vrcp.f32 %v2839_v1 }
 0x326   :  { %v3608_v17 = vpop.eup %3607 }
 0x327   :  { %v3610_v2 = vpop.eup %3609  ;;  %2851 = vst.msk [vmem:[%s4153_s3 + $0x8] sm:$0xff] %vm2849_vm4, %v3608_v17 }
 0x328   :  { %2850 = vst.msk [vmem:[%s4153_s3] sm:$0xff] %vm2849_vm4, %v3610_v2 }
 0x32a   :  { %v3612_v3 = vpop.eup %3611 }
 0x32b   :  { %v3614_v20 = vpop.eup %3613  ;;  %2853 = vst.msk [vmem:[%s4153_s3 + $0x18] sm:$0xff] %vm2849_vm4, %v3612_v3 }
 0x32c   :  { %2852 = vst.msk [vmem:[%s4153_s3 + $0x10] sm:$0xff] %vm2849_vm4, %v3614_v20 }

</bundles_post_ra>
